<compile_context>
chip_gen: v7x
topology: tpu7x:2x2x1
jax: 0.10.0
libtpu: 0.0.40
codegen_flags: <defaults>
</compile_context>

<pallas_src>
import functools

import jax
import jax.numpy as jnp
from jax.experimental import pallas as pl
from jax.experimental.pallas import tpu as pltpu


def _round_up(v, m):
    return ((v + m - 1) // m) * m


def _stretch_kernel(x_ref, o_ref, *, x_scale, y_scale, r_dim, t_dim,
                    r_blk, t_blk, compute_dtype):
    x = x_ref[0]                                           # (r_blk, t_blk)
    if x.dtype != compute_dtype:
        x = x.astype(compute_dtype)

    # ---- ragged-edge masking --------------------------------------------
    # Out-of-bounds parts of edge blocks hold stale VMEM (possibly NaN/Inf)
    # and 0 * NaN = NaN, so any row/lane that feeds a one-hot contraction must
    # be zeroed.  Garbage that only ever reaches out-of-bounds *output*
    # rows/lanes is clipped by Pallas on writeback and needs no mask.  The
    # mask is a few VPU passes over the small input tile - negligible next to
    # the x_scale*y_scale-times larger output write.
    need_row_mask = (y_scale > 1) and (r_dim % r_blk != 0)
    need_lane_mask = (x_scale > 1) and (t_dim % t_blk != 0)
    if need_row_mask or need_lane_mask:
        valid = None
        if need_row_mask:
            rows = jax.lax.broadcasted_iota(jnp.int32, (r_blk, t_blk), 0)
            valid = rows < (r_dim - pl.program_id(1) * r_blk)
        if need_lane_mask:
            lanes = jax.lax.broadcasted_iota(jnp.int32, (r_blk, t_blk), 1)
            lv = lanes < (t_dim - pl.program_id(2) * t_blk)
            valid = lv if valid is None else (valid & lv)
        x = jnp.where(valid, x, jnp.zeros((), compute_dtype))

    # ---- one-hot expansion matrices, generated in-kernel ------------------
    def lane_expand(v):
        # (r, t_blk) -> (r, t_blk * x_scale):  out[:, k] = v[:, k // x_scale]
        t = jax.lax.broadcasted_iota(jnp.int32, (t_blk, t_blk * x_scale), 0)
        k = jax.lax.broadcasted_iota(jnp.int32, (t_blk, t_blk * x_scale), 1)
        ex = ((k >= t * x_scale) & (k < (t + 1) * x_scale)).astype(compute_dtype)
        return jnp.dot(v, ex, preferred_element_type=compute_dtype)

    def row_expand(v):
        # (r_blk, t) -> (r_blk * y_scale, t):  out[r, :] = v[r // y_scale, :]
        r = jax.lax.broadcasted_iota(jnp.int32, (r_blk * y_scale, r_blk), 0)
        f = jax.lax.broadcasted_iota(jnp.int32, (r_blk * y_scale, r_blk), 1)
        ey = ((r >= f * y_scale) & (r < (f + 1) * y_scale)).astype(compute_dtype)
        return jnp.dot(ey, v, preferred_element_type=compute_dtype)

    # Do the cheaper (smaller-scale-factor) expansion first: the first
    # matmul's cost is not amplified by the other scale factor.
    if x_scale > 1 and y_scale > 1:
        if x_scale <= y_scale:
            x = row_expand(lane_expand(x))
        else:
            x = lane_expand(row_expand(x))
    elif x_scale > 1:
        x = lane_expand(x)
    elif y_scale > 1:
        x = row_expand(x)

    o_ref[0] = x.astype(o_ref.dtype)


def stretch2d(x, x_scale, y_scale, *, target_block_bytes=4 << 20,
              max_contract=256, block_rows=None, block_cols=None):
    """Nearest-neighbour upsample of (B, C, F, T) by (y_scale, x_scale)."""
    assert x.ndim == 4
    x_scale = int(x_scale)
    y_scale = int(y_scale)
    assert x_scale >= 1 and y_scale >= 1
    B, C, F, T = x.shape

    if x_scale == 1 and y_scale == 1:           # identity fast path
        return x

    itemsize = jnp.dtype(x.dtype).itemsize
    # bf16 stays bf16 (native MXU path; one-hot expansion is exact in any
    # dtype); everything else computes in f32.
    compute_dtype = x.dtype if x.dtype == jnp.bfloat16 else jnp.float32

    # Unified 3-D view (G, R, T): when y_scale == 1 the row axis never
    # interleaves, so (B, C, F) merges into one big MXU-free row axis.
    if y_scale == 1:
        G, R = 1, B * C * F
    else:
        G, R = B * C, F
    x3 = x.reshape(G, R, T)                     # adjacent-dim merges: free

    r_align = 16 if itemsize == 2 else (32 if itemsize == 1 else 8)

    # ---- tile selection ----------------------------------------------------
    # Contraction depths capped at `max_contract` (keeps the one-hot matmuls
    # under the MXU roofline on v5e/v6e/v7x); the axis whose scale factor is 1
    # feeds no matmul, so it is grown to hit the per-step output-byte target.
    if block_cols is not None:
        t_blk = int(block_cols)
    else:
        t_blk = T if T <= max_contract else max_contract
    if block_rows is not None:
        r_blk = int(block_rows)
    else:
        r_blk = R if R <= max_contract else max_contract

    def out_tile_bytes(rb, tb):
        return rb * y_scale * tb * x_scale * itemsize

    if block_rows is None and y_scale == 1:
        while r_blk < R and out_tile_bytes(r_blk, t_blk) < target_block_bytes:
            r_blk = min(_round_up(R, r_align), r_blk * 2)
    if block_cols is None and x_scale == 1:
        while t_blk < T and out_tile_bytes(r_blk, t_blk) < target_block_bytes:
            t_blk = min(_round_up(T, 128), t_blk * 2)

    if t_blk < T:
        assert t_blk % 128 == 0, "column block must be a multiple of 128"
    if r_blk < R:
        assert r_blk % r_align == 0, f"row block must be a multiple of {r_align}"

    grid = (G, pl.cdiv(R, r_blk), pl.cdiv(T, t_blk))

    kernel = functools.partial(
        _stretch_kernel, x_scale=x_scale, y_scale=y_scale,
        r_dim=R, t_dim=T, r_blk=r_blk, t_blk=t_blk,
        compute_dtype=compute_dtype)

    out_R, out_T = R * y_scale, T * x_scale

    # VMEM: double-buffered in/out pipeline buffers + matmul intermediates.
    in_tile = r_blk * t_blk * itemsize
    out_tile = out_tile_bytes(r_blk, t_blk)
    vmem_est = 2 * in_tile + 4 * out_tile + (8 << 20)
    vmem_limit = int(min(max(vmem_est, 32 << 20), 64 << 20))

    # Advisory cost estimate (output-write dominated).
    if x_scale > 1 and y_scale > 1:
        macs_per_elem = (t_blk / y_scale + r_blk) if x_scale <= y_scale \
            else (r_blk / x_scale + t_blk)
    elif x_scale > 1:
        macs_per_elem = t_blk
    else:
        macs_per_elem = r_blk
    out_elems = G * out_R * out_T
    cost = pl.CostEstimate(
        flops=int(2 * macs_per_elem * out_elems),
        transcendentals=0,
        bytes_accessed=int(x.size * itemsize + out_elems * itemsize))

    out = pl.pallas_call(
        kernel,
        out_shape=jax.ShapeDtypeStruct((G, out_R, out_T), x.dtype),
        grid_spec=pltpu.PrefetchScalarGridSpec(
            num_scalar_prefetch=0,
            grid=grid,
            in_specs=[
                pl.BlockSpec((1, r_blk, t_blk), lambda g, ri, ti: (g, ri, ti)),
            ],
            out_specs=pl.BlockSpec((1, r_blk * y_scale, t_blk * x_scale),
                                   lambda g, ri, ti: (g, ri, ti)),
        ),
        compiler_params=pltpu.CompilerParams(
            dimension_semantics=("parallel", "parallel", "parallel"),
            vmem_limit_bytes=vmem_limit,
        ),
        cost_estimate=cost,
    )(x3)

    return out.reshape(B, C, F * y_scale, T * x_scale)


def _stretch2d_ref(x, x_scale, y_scale):
    """Pure-JAX reference (== F.interpolate nearest with integer scales)."""
    return jnp.repeat(jnp.repeat(x, y_scale, axis=2), x_scale, axis=3)


if __name__ == "__main__":
    key = jax.random.PRNGKey(0)
    k1, k2, k3 = jax.random.split(key, 3)

    # f32 test values are quantized to the bf16 grid so the expected result is
    # bit-exact no matter which multi-pass scheme the MXU uses for f32 one-hot
    # matmuls (arbitrary f32 inputs are reproduced to ~1 ulp).

    # Case 1: both scales > 1, forced small blocks -> multi-tile, ragged rows
    # and lanes, both one-hot matmuls, masked-edge path.
    B, C, F, T = 2, 3, 40, 200
    x1 = jax.random.uniform(k1, (B, C, F, T), jnp.float32, minval=-1.0, maxval=1.0)
    x1 = x1.astype(jnp.bfloat16).astype(jnp.float32)
    y1 = jax.block_until_ready(
        stretch2d(x1, x_scale=2, y_scale=3, block_rows=16, block_cols=128))
    ref1 = _stretch2d_ref(x1, 2, 3)
    assert y1.shape == (B, C, F * 3, T * 2)
    assert jnp.allclose(y1, ref1, rtol=1e-6, atol=1e-6)

    # Case 2: common vocoder configuration (y_scale == 1) -> merged-row path,
    # default (output-sized) tiles, single matmul.
    x2 = jax.random.uniform(k2, (2, 1, 80, 60), jnp.float32, minval=0.0, maxval=4.0)
    x2 = x2.astype(jnp.bfloat16).astype(jnp.float32)
    y2 = jax.block_until_ready(stretch2d(x2, x_scale=4, y_scale=1))
    ref2 = _stretch2d_ref(x2, 4, 1)
    assert y2.shape == (2, 1, 80, 240)
    assert jnp.allclose(y2, ref2, rtol=1e-6, atol=1e-6)

    # Identity fast path.
    assert stretch2d(x2, 1, 1) is x2

    # Case 3: native bf16 compute path (both matmuls stay bf16 on the MXU).
    x3 = jax.random.uniform(k3, (1, 2, 16, 128), jnp.float32,
                            minval=-1.0, maxval=1.0).astype(jnp.bfloat16)
    y3 = jax.block_until_ready(stretch2d(x3, x_scale=2, y_scale=2))
    ref3 = _stretch2d_ref(x3, 2, 2)
    assert y3.shape == (1, 2, 32, 256)
    assert y3.dtype == jnp.bfloat16
    assert jnp.allclose(y3.astype(jnp.float32), ref3.astype(jnp.float32),
                        rtol=0.0, atol=1e-2)

    print("KERNEL_OK")
</pallas_src>

<mosaic_0001>
module attributes {stable_mosaic.version = 11 : i64} {
  func.func @_stretch_kernel(%arg0: i32, %arg1: i32, %arg2: i32, %arg3: memref<1x16x128xf32, #tpu.memory_space<vmem>>, %arg4: memref<1x48x256xf32, #tpu.memory_space<vmem>>) attributes {dimension_semantics = [#tpu.dimension_semantics<parallel>, #tpu.dimension_semantics<parallel>, #tpu.dimension_semantics<parallel>], iteration_bounds = array<i64: 6, 3, 2>, scalar_prefetch = 0 : i64, scratch_operands = 0 : i64, tpu.core_type = #tpu.core_type<tc>, window_params = [{transform_indices = @transform_0, window_bounds = array<i64: 1, 16, 128>}, {transform_indices = @transform_1, window_bounds = array<i64: 1, 48, 256>}]} {
    %c0 = arith.constant 0 : index
    %c0_0 = arith.constant 0 : index
    %c0_1 = arith.constant 0 : index
    %0 = vector.load %arg3[%c0, %c0_0, %c0_1] : memref<1x16x128xf32, #tpu.memory_space<vmem>>, vector<1x16x128xf32>
    %1 = vector.shape_cast %0 : vector<1x16x128xf32> to vector<16x128xf32>
    %2 = tpu.iota {dimensions = array<i32: 0>} : vector<16x128xi32>
    %c16_i32 = arith.constant 16 : i32
    %3 = arith.muli %arg1, %c16_i32 : i32
    %c40_i32 = arith.constant 40 : i32
    %4 = arith.subi %c40_i32, %3 : i32
    %5 = vector.broadcast %4 : i32 to vector<16x128xi32>
    %6 = arith.cmpi slt, %2, %5 : vector<16x128xi32>
    %7 = tpu.iota {dimensions = array<i32: 1>} : vector<16x128xi32>
    %c128_i32 = arith.constant 128 : i32
    %8 = arith.muli %arg2, %c128_i32 : i32
    %c200_i32 = arith.constant 200 : i32
    %9 = arith.subi %c200_i32, %8 : i32
    %10 = vector.broadcast %9 : i32 to vector<16x128xi32>
    %11 = arith.cmpi slt, %7, %10 : vector<16x128xi32>
    %12 = arith.andi %6, %11 : vector<16x128xi1>
    %cst = arith.constant 0.000000e+00 : f32
    %13 = vector.broadcast %cst : f32 to vector<16x128xf32>
    %14 = arith.select %12, %1, %13 : vector<16x128xi1>, vector<16x128xf32>
    %15 = tpu.iota {dimensions = array<i32: 0>} : vector<128x256xi32>
    %16 = tpu.iota {dimensions = array<i32: 1>} : vector<128x256xi32>
    %c2_i32 = arith.constant 2 : i32
    %17 = vector.broadcast %c2_i32 : i32 to vector<128x256xi32>
    %18 = arith.muli %15, %17 : vector<128x256xi32>
    %19 = arith.cmpi sge, %16, %18 : vector<128x256xi32>
    %c1_i32 = arith.constant 1 : i32
    %20 = vector.broadcast %c1_i32 : i32 to vector<128x256xi32>
    %21 = arith.addi %15, %20 : vector<128x256xi32>
    %c2_i32_2 = arith.constant 2 : i32
    %22 = vector.broadcast %c2_i32_2 : i32 to vector<128x256xi32>
    %23 = arith.muli %21, %22 : vector<128x256xi32>
    %24 = arith.cmpi slt, %16, %23 : vector<128x256xi32>
    %25 = arith.andi %19, %24 : vector<128x256xi1>
    %26 = arith.extui %25 : vector<128x256xi1> to vector<128x256xi32>
    %27 = arith.sitofp %26 : vector<128x256xi32> to vector<128x256xf32>
    %cst_3 = arith.constant dense<0.000000e+00> : vector<16x256xf32>
    %28 = tpu.matmul %14, %27, %cst_3 {dimension_numbers = #tpu.dot_dimension_numbers<[1], [0], [0], [1], [0, 0, 1, 1], [], []>} : vector<16x128xf32>, vector<128x256xf32>, vector<16x256xf32> -> vector<16x256xf32>
    %29 = tpu.iota {dimensions = array<i32: 0>} : vector<48x16xi32>
    %30 = tpu.iota {dimensions = array<i32: 1>} : vector<48x16xi32>
    %c3_i32 = arith.constant 3 : i32
    %31 = vector.broadcast %c3_i32 : i32 to vector<48x16xi32>
    %32 = arith.muli %30, %31 : vector<48x16xi32>
    %33 = arith.cmpi sge, %29, %32 : vector<48x16xi32>
    %c1_i32_4 = arith.constant 1 : i32
    %34 = vector.broadcast %c1_i32_4 : i32 to vector<48x16xi32>
    %35 = arith.addi %30, %34 : vector<48x16xi32>
    %c3_i32_5 = arith.constant 3 : i32
    %36 = vector.broadcast %c3_i32_5 : i32 to vector<48x16xi32>
    %37 = arith.muli %35, %36 : vector<48x16xi32>
    %38 = arith.cmpi slt, %29, %37 : vector<48x16xi32>
    %39 = arith.andi %33, %38 : vector<48x16xi1>
    %40 = arith.extui %39 : vector<48x16xi1> to vector<48x16xi32>
    %41 = arith.sitofp %40 : vector<48x16xi32> to vector<48x16xf32>
    %cst_6 = arith.constant dense<0.000000e+00> : vector<48x256xf32>
    %42 = tpu.matmul %41, %28, %cst_6 {dimension_numbers = #tpu.dot_dimension_numbers<[1], [0], [0], [1], [0, 0, 1, 1], [], []>} : vector<48x16xf32>, vector<16x256xf32>, vector<48x256xf32> -> vector<48x256xf32>
    %c0_7 = arith.constant 0 : index
    %c0_8 = arith.constant 0 : index
    %c0_9 = arith.constant 0 : index
    %43 = vector.load %arg4[%c0_7, %c0_8, %c0_9] : memref<1x48x256xf32, #tpu.memory_space<vmem>>, vector<1x48x256xf32>
    %44 = vector.shape_cast %43 : vector<1x48x256xf32> to vector<48x256xf32>
    %45 = vector.shape_cast %42 : vector<48x256xf32> to vector<1x48x256xf32>
    tpu.vector_store %arg4[%c0_7, %c0_8, %c0_9], %45 {strides = array<i32>} : memref<1x48x256xf32, #tpu.memory_space<vmem>>, vector<1x48x256xf32>,
    return
  }
  func.func @transform_0(%arg0: i32, %arg1: i32, %arg2: i32) -> (i32, i32, i32) {
    %c0_i32 = arith.constant 0 : i32
    return %arg0, %arg1, %arg2 : i32, i32, i32
  }
  func.func @transform_1(%arg0: i32, %arg1: i32, %arg2: i32) -> (i32, i32, i32) {
    %c0_i32 = arith.constant 0 : i32
    return %arg0, %arg1, %arg2 : i32, i32, i32
  }
}

</mosaic_0001>

<bundles_post_ra>
// kernel: tpu_custom_call.1
= control target key start
LH: loop header
LB: loop body
LE: loop exit
PB: predicated region body
PF: predicated region fallthrough
CT: control target
= control target key end

     0   :  { %6 = vsyncpa [#allocation3], 0  ;;  %s2106_s0 = inlined_call_operand.hbm [shape: f32[6,40,200], index: 0, kind: input, shape index: {}]   ;;  %s2107_s1 = inlined_call_operand.vmem [shape: f32[6,120,400], index: 1, kind: output, shape index: {}]  }
   0x1   :  { %8 = vsyncpa [#allocation3 + $0x1], 0  ;;  %s1385_s6 = smov 0   ;;  %s1387_s7 = smov 0  }
   0x2   :  { %s1389_s8 = smov 0   ;;  %s1391_s9 = smov 0  }
   0x3   :  { %s1393_s10 = smov 0   ;;  %s1395_s11 = smov 0  }
   0x4   :  { %s1397_s12 = smov 0   ;;  %s1399_s13 = smov 0  }
   0x5   :  { %s1401_s14 = smov 0   ;;  %s1403_s15 = smov 0  }
   0x6 LB: > { %s26_s16 = sadd.s32 1, %s1323_s12  ;;  %s29_s17 = sadd.s32 1, %s1327_s13  ;;  %s1335_s15 = sphi %s1403_s15, %s14_s15   ;;  %s1331_s14 = sphi %s1401_s14, %s2220_s14   ;;  %s1327_s13 = sphi %s1399_s13, %s2219_s13   ;;  %s1323_s12 = sphi %s1397_s12, %s2218_s12   ;;  %s1319_s11 = sphi %s1395_s11, %s2217_s11   ;;  %s1315_s10 = sphi %s1393_s10, %s2216_s10   ;;  %s1311_s9 = sphi %s1391_s9, %s2215_s9   ;;  %s1307_s8 = sphi %s1389_s8, %s2214_s8   ;;  %s1303_s7 = sphi %s1387_s7, %s2213_s7   ;;  %s1299_s6 = sphi %s1385_s6, %s2212_s6  }
   0x7   : > { %p27_p0 = scmp.ge.s32.totalorder %s26_s16, 2  ;;  %s887_s18 = sadd.s32 4294967295, %s1335_s15  }
   0x8   : > { %s33_s19 = sadd.s32 1, %s1331_s14  ;;  %p51_p1 = scmp.ne.s32.totalorder %s1307_s8, %s1303_s7 }
   0x9   : > { %s2222_s16 = smov (%p27_p0, %s26_s16), 0  ;;  %s2224_s17 = smov (!%p27_p0, %s29_s17), %s1327_s13 }
   0xa   : > { %p31_p2 = scmp.ge.s32.totalorder %s2224_s17, 3  ;;  %p52_p3 = scmp.eq.s32.totalorder %s1335_s15, 0 }
   0xb   : > { %p57_p4 = scmp.ne.s32.totalorder %s1303_s7, %s1299_s6  ;;  %p58_p5 = scmp.eq.s32.totalorder %s887_s18, 0 }
   0xc   : > { %s2226_s17 = smov (%p31_p2, %s2224_s17), 0  ;;  %s2228_s19 = smov (!%p31_p2, %s33_s19), %s1331_s14 }
   0xd   : > { %p1450_p6 = por %p52_p3, %p51_p1  ;;  %p35_p7 = scmp.ge.s32.totalorder %s2228_s19, 6 }
   0xe   : > { %p1454_p8 = por %p58_p5, %p57_p4  ;;  %s38_s22 = ssub.s32 %s1327_s13, %s2226_s17 }
   0xf   : > { %p85_p9 = scmp.eq.s32.totalorder %s887_s18, 35  ;;  %s2230_s19 = smov (%p35_p7, %s2228_s19), 0 }
  0x10   : > { %s40_s23 = ssub.s32 %s1323_s12, %s2222_s16  ;;  %s37_s25 = ssub.s32 %s1331_s14, %s2230_s19 }
  0x11   : > { %p1467_p10 = por %p85_p9, %p51_p1  ;;  %s39_s26 = sor.u32 %s38_s22, %s37_s25 }
  0x12   : > { %s41_s27 = sor.u32 %s40_s23, %s39_s26  ;;  %s44_s28 = sadd.s32 1, %s1307_s8 }
  0x13   : > { %p42_p11 = scmp.eq.s32.totalorder %s41_s27, 0  ;;  %p890_p12 = scmp.ge.s32.totalorder %s1335_s15, 36 }
  0x15   : > { %s1475_s29 = scalar_select %p42_p11, %s1307_s8, %s44_s28  }
  0x16   : > { %107 = sbr.rel (%p890_p12) target bundleno = 68 (0x44), region = 16 }
  0x1d   : > { %110 = sbr.rel (!%p1450_p6) target bundleno = 68 (0x44), region = 20  ;;  %s111_s30 = sand.u32 (%p1450_p6), 1, %s1307_s8  }
  0x1e   : > { %s892_s2 = sshll.u32 (%p1450_p6), %s1327_s13, 1  ;;  %s891_s3 = sshll.u32 (%p1450_p6), %s111_s30, 4 }
  0x1f   : > { %s117_s4 = ssub.s32 (%p1450_p6), 5, %s892_s2  ;;  %s1485_s18 = scalar_lea.sflag (%p1450_p6), [#allocation3], %s111_s30 }
  0x20   : > { %p118_p13 = scmp.lt.s32.totalorder (%p1450_p6), %s117_s4, 2  ;;  %s115_s22 = scalar_lea.vmem (%p1450_p6), [#allocation2], %s891_s3 }
  0x24   : > { %s2232_s4 = smov (!%p118_p13, %s117_s4), 2 }
  0x25   : > { %s1482_s5 = sshll.u32 %s2232_s4, 7 }
  0x26   : > { %s122_s6 = ssub.s32 256, %s1482_s5 }
  0x27   : > { %123 = vsyncadd %s1485_s18, %s122_s6  ;;  %p894_p0 = scmp.ne.s32.totalorder %s1482_s5, 0  ;;  %s996_s20 = sshll.u32 %s1327_s13, 2 }
  0x28   : > { %s126_s23 = sadd.s32 %s1323_s12, %s996_s20  ;;  %s1035_s25 = smul.u32 10, %s1331_s14 }
  0x29   : > { %s132_s26 = sshll.u32 %s115_s22, 4  ;;  %s1197_s20 = scalar_lea.hbm %s2106_s0, 7680  ;;  %s1492_s26 = int_to_ptr.vmem [resolvable:$true] %s132_s26 }
  0x2a   : > { %s128_s27 = sadd.s32 %s1035_s25, %s126_s23 }
  0x2b   : > { %s896_s28 = sshll.u32 %s128_s27, 7 }
  0x2c   : > { %s1497_s3 = scalar_lea.hbm %s2106_s0, %s896_s28 }
  0x2d   : > { %s1193_s4 = scalar_lea.hbm %s1497_s3, %s1482_s5  ;;  %p1198_p4 = scmp.lt.u32.totalorder %s1497_s3, %s2106_s0 }
  0x2e   : > { %p1194_p1 = scmp.ne.s32.totalorder %s1497_s3, %s1193_s4  ;;  %p1199_p5 = scmp.lt.u32.totalorder %s1197_s20, %s1193_s4 }
  0x2f   : > { %p1201_p7 = scmp.lt.u32.totalorder %s1193_s4, %s1497_s3 }
  0x30   : > { %p1195_p2 = pnand %p1194_p1, %p894_p0  ;;  %p1200_p6 = por %p1199_p5, %p1198_p4 }
  0x32   : > { %p1196_p3 = pneg %p1195_p2  ;;  %p1202_p9 = por %p1201_p7, %p1200_p6 }
  0x34   : > { %p1203_p11 = pnand %p1202_p9, %p1196_p3 }
  0x36   : > { %1206 = shalt.err (!%p1203_p11)
}
  0x37   : > { %s1207_s27 = scalar_lea.vmem %s1492_s26, %s1482_s5  ;;  %s1369_s28 = smov [#allocation2]  }
  0x38   : > { %p1208_p12 = scmp.ne.s32.totalorder %s1492_s26, %s1207_s27  ;;  %s1211_s30 = sshll.u32 %s1369_s28, 4  ;;  %s1212_s30 = int_to_ptr.vmem [resolvable:$false] %s1211_s30 }
  0x39   : > { %s1213_s2 = scalar_lea.vmem %s1212_s30, 512  ;;  %p1214_p2 = scmp.lt.s32.totalorder %s1492_s26, %s1212_s30 }
  0x3a   : > { %p1209_p13 = pnand %p1208_p12, %p894_p0  ;;  %p1215_p4 = scmp.lt.s32.totalorder %s1213_s2, %s1207_s27 }
  0x3c   : > { %p1210_p1 = pneg %p1209_p13  ;;  %p1216_p5 = por %p1215_p4, %p1214_p2 }
  0x3e   : > { %p1217_p6 = pnand %p1216_p5, %p1210_p1 }
  0x40   : > { %1220 = shalt.err (!%p1217_p6)
}
  0x41   : > { %s1370_s4 = smov 256   ;;  %s1371_s6 = smov 128  }
  0x42   : > { %s1372_s22 = smov 8  }
  0x43   : > { %138 = dma.hbm_to_vmem [thread:$0]  (%p894_p0), %s1497_s3, %s1482_s5, %s1492_s26, %s1485_s18, %s1370_s4, %s1371_s6, %s1372_s22  }
  0x44 PF: > { %p899_p3 = scmp.ge.s32.totalorder %s1335_s15, 1  ;;  %p140_p7 = scmp.lt.s32.totalorder %s1335_s15, 37 }
  0x46   : > { %p141_p9 = pnand %p899_p3, %p140_p7 }
  0x47   : > { %s1527_s20 = sand.u32 (!%p141_p9), 1, %s1303_s7   ;;  %v182_v0 = vlaneseq (!%p141_p9) }
  0x48   : > { %144 = sbr.rel (%p141_p9) target bundleno = 656 (0x290), region = 24  ;;  %s900_s23 = sshll.u32 (!%p141_p9), %s1527_s20, 4 }
  0x49   : > { %s147_s25 = scalar_lea.sflag (!%p141_p9), [#allocation3], %s1527_s20  ;;  %s1531_s27 = scalar_lea.vmem (!%p141_p9), [#allocation2], %s900_s23 }
  0x4f   : > { %1294 = dma.done.wait (%p1454_p8), %s147_s25, 256  }
  0x50   : > { %1296 = vsyncadd (%p1454_p8), %s147_s25, 4294967040  ;;  %v1373_v1 = vmov 0.0   ;;  %v1539_v2 = vshrl.u32 %v182_v0, 7  ;;  %v1541_v3 = vand.u32 127, %v182_v0  ;;  %v1374_v33 = vmov 1.0|1.0  }
  0x51   : > { %487 = vmatprep.mubr.f32.mxu0 %v1373_v1  ;;  %616 = vmatprep.mubr.f32.mxu1 %v1373_v1  ;;  %s901_s21 = sshll.u32 %s1315_s10, 4  ;;  %s902_s5 = sshll.u32 %s1311_s9, 7 }
  0x52   : > { %v1544_v4 = vadd.s32 8, %v1539_v2  ;;  %v1547_v5 = vadd.s32 128, %v1541_v3  ;;  %v215_v6 = vmul.u32 2, %v1539_v2  ;;  %v263_v7 = vadd.s32 1, %v1539_v2  ;;  %s186_s18 = ssub.s32 40, %s901_s21  ;;  %s193_s26 = ssub.s32 200, %s902_s5 }
  0x53   : > { %v1552_v8 = vadd.s32 16, %v1539_v2  ;;  %v1555_v9 = vadd.s32 24, %v1539_v2  ;;  %v1571_v16 = vadd.s32 32, %v1539_v2  ;;  %v1574_v17 = vadd.s32 40, %v1539_v2  ;;  %s1036_s3 = smul.u32 96, %s1527_s20  ;;  %s981_s2 = sshll.u32 (%p1467_p10), %s1311_s9, 1 }
  0x54   : > { %v216_v10 = vmul.u32 2, %v1544_v4  ;;  %vm1559_vm0 = vcmp.ge.s32.totalorder %v1547_v5, %v215_v6  ;;  %v264_v12 = vadd.s32 1, %v1544_v4  ;;  %v279_v13 = vmul.u32 2, %v263_v7  ;;  %v181_v7 = vld [vmem:[%s1531_s27 + $0x8] sm:$0xff]  ;;  %s672_s30 = smul.u32 (%p1467_p10), 6, %s1315_s10 }
  0x55   : > { %vm1565_vm1 = vcmp.ge.s32.totalorder %v1541_v3, %v215_v6  ;;  %v265_v15 = vadd.s32 1, %v1552_v8  ;;  %v217_v21 = vmul.u32 2, %v1552_v8  ;;  %v218_v23 = vmul.u32 2, %v1555_v9  ;;  %s1997_s28 = scalar_lea.vmem [#allocation4], %s1036_s3   ;;  %s998_s4 = smul.u32 (%p1467_p10), 24, %s1315_s10 }
  0x56   : > { %vm1577_vm2 = vcmp.ge.s32.totalorder %v1547_v5, %v216_v10  ;;  %v280_v19 = vmul.u32 2, %v264_v12  ;;  %vm1582_vm3 = vcmp.lt.s32.totalorder %v1547_v5, %v279_v13  ;;  %vm1592_vm5 = vcmp.lt.s32.totalorder %v1541_v3, %v279_v13  ;;  %s674_s6 = ssub.s32 (%p1467_p10), 15, %s672_s30  ;;  %s1037_s22 = smul.u32 (%p1467_p10), 60, %s1319_s11 }
  0x57   : > { %vm328_vm4 = vmand %vm1559_vm0, %vm1582_vm3  ;;  %v266_v24 = vadd.s32 1, %v1555_v9  ;;  %vm1600_vm7 = vcmp.ge.s32.totalorder %v1541_v3, %v216_v10  ;;  %v281_v27 = vmul.u32 2, %v265_v15  ;;  %v267_v29 = vadd.s32 1, %v1571_v16  ;;  %p675_p8 = scmp.lt.s32.totalorder (%p1467_p10), %s674_s6, 6  ;;  %s681_s20 = sadd.s32 (%p1467_p10), %s998_s4, %s981_s2 }
  0x58   : > { %vm298_vm6 = vcmp.lt.s32.totalorder %v1547_v5, %v280_v19  ;;  %vm1605_vm8 = vcmp.lt.s32.totalorder %v1541_v3, %v280_v19  ;;  %vm327_vm9 = vmand %vm1565_vm1, %vm1592_vm5  ;;  %vm1617_vm12 = vcmp.ge.s32.totalorder %v1547_v5, %v217_v21  ;;  %v268_v32 = vadd.s32 1, %v1574_v17  ;;  %s683_s23 = sadd.s32 (%p1467_p10), %s1037_s22, %s681_s20 }
  0x59   : > { %vm330_vm10 = vmand %vm1577_vm2, %vm298_vm6  ;;  %v282_v28 = vmul.u32 2, %v266_v24  ;;  %vm1622_vm13 = vcmp.lt.s32.totalorder %v1547_v5, %v281_v27  ;;  %vm1633_vm15 = vcmp.ge.s32.totalorder %v1547_v5, %v218_v23  ;;  %vm1643_vm2 = vcmp.ge.s32.totalorder %v1541_v3, %v217_v21  ;;  %s986_s25 = sshll.u32 (%p1467_p10), %s683_s23, 3 }
  0x5a   : > { %vm999_vm11 = vmpackc.low %vm330_vm10, %vm328_vm4  ;;  %vm1648_vm3 = vcmp.lt.s32.totalorder %v1541_v3, %v281_v27  ;;  %v219_v38 = vmul.u32 2, %v1571_v16  ;;  %v283_v39 = vmul.u32 2, %v267_v29  ;;  %v204_v42 = vadd.s32 48, %v1539_v2  ;;  %s2023_s5 = scalar_lea.vmem (%p1467_p10), %s2107_s1, %s986_s25  }
  0x5b   : > { %1000 = vmatprep.subr.msk.bf16.mxu0 %vm999_vm11, %v1374_v33  ;;  %vm329_vm14 = vmand %vm1600_vm7, %vm1605_vm8  ;;  %vm1638_vm0 = vcmp.lt.s32.totalorder %v1547_v5, %v282_v28  ;;  %v220_v40 = vmul.u32 2, %v1574_v17  ;;  %v284_v41 = vmul.u32 2, %v268_v32  ;;  %v205_v43 = vadd.s32 56, %v1539_v2 }
  0x5c   : > { %vm1001_vm1 = vmpackc.low %vm329_vm14, %vm327_vm9  ;;  %vm1666_vm6 = vcmp.ge.s32.totalorder %v1541_v3, %v218_v23  ;;  %vm301_vm7 = vcmp.lt.s32.totalorder %v1541_v3, %v282_v28  ;;  %v269_v45 = vadd.s32 1, %v204_v42  ;;  %vm1677_vm10 = vcmp.ge.s32.totalorder %v1547_v5, %v219_v38 }
  0x5d   : > { %1002 = vmatpush1.bf16.msk.msra.mxu0 %vm1001_vm1, %v1374_v33  ;;  %vm332_vm4 = vmand %vm1617_vm12, %vm1622_vm13  ;;  %v270_v46 = vadd.s32 1, %v205_v43  ;;  %vm1682_vm11 = vcmp.lt.s32.totalorder %v1547_v5, %v283_v39  ;;  %v206_v49 = vadd.s32 64, %v1539_v2  ;;  %vm1690_vm13 = vcmp.ge.s32.totalorder %v1547_v5, %v220_v40 }
  0x5e   : > { %vm334_vm5 = vmand %vm1633_vm15, %vm1638_vm0  ;;  %vm1695_vm14 = vcmp.lt.s32.totalorder %v1547_v5, %v284_v41  ;;  %v207_v52 = vadd.s32 72, %v1539_v2  ;;  %v221_v53 = vmul.u32 2, %v204_v42  ;;  %v285_v54 = vmul.u32 2, %v269_v45 }
  0x5f   : > { %vm1003_vm8 = vmpackc.low %vm334_vm5, %vm332_vm4  ;;  %vm1706_vm1 = vcmp.ge.s32.totalorder %v1541_v3, %v219_v38  ;;  %v222_v57 = vmul.u32 2, %v205_v43  ;;  %v286_v58 = vmul.u32 2, %v270_v46  ;;  %vm1720_vm4 = vcmp.ge.s32.totalorder %v1541_v3, %v220_v40 }
  0x60   : > { %1004 = vmatprep.subr.msk.bf16.mxu0 %vm1003_vm8, %v1374_v33  ;;  %vm331_vm9 = vmand %vm1643_vm2, %vm1648_vm3  ;;  %vm1711_vm2 = vcmp.lt.s32.totalorder %v1541_v3, %v283_v39  ;;  %vm305_vm5 = vcmp.lt.s32.totalorder %v1541_v3, %v284_v41  ;;  %v271_v60 = vadd.s32 1, %v206_v49  ;;  %v272_v61 = vadd.s32 1, %v207_v52 }
  0x61   : > { %vm333_vm12 = vmand %vm1666_vm6, %vm301_vm7  ;;  %vm1731_vm8 = vcmp.ge.s32.totalorder %v1547_v5, %v221_v53  ;;  %v208_v0 = vadd.s32 80, %v1539_v2  ;;  %v209_v10 = vadd.s32 88, %v1539_v2  ;;  %v223_v11 = vmul.u32 2, %v206_v49 }
  0x62   : > { %vm1005_vm15 = vmpackc.low %vm333_vm12, %vm331_vm9  ;;  %vm1736_vm9 = vcmp.lt.s32.totalorder %v1547_v5, %v285_v54  ;;  %vm1749_vm12 = vcmp.lt.s32.totalorder %v1547_v5, %v286_v58  ;;  %v287_v12 = vmul.u32 2, %v271_v60  ;;  %v224_v15 = vmul.u32 2, %v207_v52 }
  0x63   : > { %1006 = vmatpush1.bf16.msk.msra.mxu0 %vm1005_vm15, %v1374_v33  ;;  %vm336_vm0 = vmand %vm1677_vm10, %vm1682_vm11  ;;  %vm1744_vm11 = vcmp.ge.s32.totalorder %v1547_v5, %v222_v57  ;;  %vm1760_vm15 = vcmp.ge.s32.totalorder %v1541_v3, %v221_v53  ;;  %v288_v18 = vmul.u32 2, %v272_v61  ;;  %v273_v20 = vadd.s32 1, %v208_v0 }
  0x64   : > { %vm338_vm3 = vmand %vm1690_vm13, %vm1695_vm14  ;;  %v274_v21 = vadd.s32 1, %v209_v10  ;;  %v210_v24 = vadd.s32 96, %v1539_v2  ;;  %v211_v27 = vadd.s32 104, %v1539_v2  ;;  %v225_v28 = vmul.u32 2, %v208_v0 }
  0x65   : > { %vm1007_vm6 = vmpackc.low %vm338_vm3, %vm336_vm0  ;;  %vm1765_vm0 = vcmp.lt.s32.totalorder %v1541_v3, %v285_v54  ;;  %vm309_vm3 = vcmp.lt.s32.totalorder %v1541_v3, %v286_v58  ;;  %v289_v29 = vmul.u32 2, %v273_v20  ;;  %v226_v32 = vmul.u32 2, %v209_v10 }
  0x66   : > { %1008 = vmatprep.subr.msk.bf16.mxu0 %vm1007_vm6, %v1374_v33  ;;  %vm335_vm7 = vmand %vm1706_vm1, %vm1711_vm2  ;;  %vm1774_vm2 = vcmp.ge.s32.totalorder %v1541_v3, %v222_v57  ;;  %vm1785_vm6 = vcmp.ge.s32.totalorder %v1547_v5, %v223_v11  ;;  %v290_v34 = vmul.u32 2, %v274_v21  ;;  %v275_v36 = vadd.s32 1, %v210_v24 }
  0x67   : > { %vm337_vm10 = vmand %vm1720_vm4, %vm305_vm5  ;;  %v276_v37 = vadd.s32 1, %v211_v27  ;;  %v212_v40 = vadd.s32 112, %v1539_v2  ;;  %v213_v43 = vadd.s32 120, %v1539_v2  ;;  %v227_v44 = vmul.u32 2, %v210_v24 }
  0x68   : > { %vm1009_vm13 = vmpackc.low %vm337_vm10, %vm335_vm7  ;;  %vm1790_vm7 = vcmp.lt.s32.totalorder %v1547_v5, %v287_v12  ;;  %vm1803_vm10 = vcmp.lt.s32.totalorder %v1547_v5, %v288_v18  ;;  %v291_v45 = vmul.u32 2, %v275_v36  ;;  %v228_v48 = vmul.u32 2, %v211_v27 }
  0x69   : > { %1010 = vmatpush1.bf16.msk.msra.mxu0 %vm1009_vm13, %v1374_v33  ;;  %vm340_vm14 = vmand %vm1731_vm8, %vm1736_vm9  ;;  %vm1798_vm9 = vcmp.ge.s32.totalorder %v1547_v5, %v224_v15  ;;  %vm1814_vm13 = vcmp.ge.s32.totalorder %v1541_v3, %v223_v11  ;;  %v292_v49 = vmul.u32 2, %v276_v37  ;;  %v277_v50 = vadd.s32 1, %v212_v40 }
  0x6a   : > { %vm342_vm1 = vmand %vm1744_vm11, %vm1749_vm12  ;;  %v278_v51 = vadd.s32 1, %v213_v43  ;;  %v229_v56 = vmul.u32 2, %v212_v40  ;;  %v230_v60 = vmul.u32 2, %v213_v43  ;;  %v187_v0 = vstv %s186_s18 }
  0x6b   : > { %vm1011_vm4 = vmpackc.low %vm342_vm1, %vm340_vm14  ;;  %vm1819_vm14 = vcmp.lt.s32.totalorder %v1541_v3, %v287_v12  ;;  %vm313_vm1 = vcmp.lt.s32.totalorder %v1541_v3, %v288_v18  ;;  %v293_v57 = vmul.u32 2, %v277_v50  ;;  %v194_v6 = vstv %s193_s26 }
  0x6c   : > { %1012 = vmatprep.subr.msk.bf16.mxu0 %vm1011_vm4, %v1374_v33  ;;  %vm339_vm5 = vmand %vm1760_vm15, %vm1765_vm0  ;;  %vm1828_vm0 = vcmp.ge.s32.totalorder %v1541_v3, %v224_v15  ;;  %vm1839_vm4 = vcmp.ge.s32.totalorder %v1547_v5, %v225_v28  ;;  %v294_v61 = vmul.u32 2, %v278_v51  ;;  %v507_v10 = vadd.s32 1, %v1541_v3 }
  0x6d   : > { %vm341_vm8 = vmand %vm1774_vm2, %vm309_vm3  ;;  %v500_v11 = vmul.u32 3, %v1541_v3 }
  0x6e   : > { %vm1013_vm11 = vmpackc.low %vm341_vm8, %vm339_vm5  ;;  %vm1844_vm5 = vcmp.lt.s32.totalorder %v1547_v5, %v289_v29  ;;  %vm1857_vm8 = vcmp.lt.s32.totalorder %v1547_v5, %v290_v34  ;;  %v508_v12 = vmul.u32 3, %v507_v10 }
  0x6f   : > { %1014 = vmatpush1.bf16.msk.msra.mxu0 %vm1013_vm11, %v1374_v33  ;;  %vm344_vm12 = vmand %vm1785_vm6, %vm1790_vm7  ;;  %vm1852_vm7 = vcmp.ge.s32.totalorder %v1547_v5, %v226_v32  ;;  %vm1868_vm11 = vcmp.ge.s32.totalorder %v1541_v3, %v225_v28 }
  0x70   : > { %vm346_vm15 = vmand %vm1798_vm9, %vm1803_vm10 }
  0x71   : > { %vm1015_vm2 = vmpackc.low %vm346_vm15, %vm344_vm12  ;;  %vm1873_vm12 = vcmp.lt.s32.totalorder %v1541_v3, %v289_v29  ;;  %vm317_vm15 = vcmp.lt.s32.totalorder %v1541_v3, %v290_v34 }
  0x72   : > { %1016 = vmatprep.subr.msk.bf16.mxu0 %vm1015_vm2, %v1374_v33  ;;  %vm343_vm3 = vmand %vm1814_vm13, %vm1819_vm14  ;;  %vm253_vm14 = vcmp.ge.s32.totalorder %v1541_v3, %v226_v32  ;;  %vm1889_vm2 = vcmp.ge.s32.totalorder %v1547_v5, %v227_v44 }
  0x73   : > { %vm345_vm6 = vmand %vm1828_vm0, %vm313_vm1 }
  0x74   : > { %vm1017_vm9 = vmpackc.low %vm345_vm6, %vm343_vm3  ;;  %vm1894_vm3 = vcmp.lt.s32.totalorder %v1547_v5, %v291_v45  ;;  %vm1904_vm6 = vcmp.lt.s32.totalorder %v1547_v5, %v292_v49 }
  0x75   : > { %1018 = vmatpush1.bf16.msk.msra.mxu0 %vm1017_vm9, %v1374_v33  ;;  %vm348_vm10 = vmand %vm1839_vm4, %vm1844_vm5  ;;  %vm1899_vm5 = vcmp.ge.s32.totalorder %v1547_v5, %v228_v48  ;;  %vm1914_vm9 = vcmp.ge.s32.totalorder %v1541_v3, %v227_v44 }
  0x76   : > { %vm350_vm13 = vmand %vm1852_vm7, %vm1857_vm8 }
  0x77   : > { %vm1019_vm0 = vmpackc.low %vm350_vm13, %vm348_vm10  ;;  %vm1919_vm10 = vcmp.lt.s32.totalorder %v1541_v3, %v291_v45  ;;  %vm321_vm13 = vcmp.lt.s32.totalorder %v1541_v3, %v292_v49 }
  0x78   : > { %1020 = vmatprep.subr.msk.bf16.mxu0 %vm1019_vm0, %v1374_v33  ;;  %vm347_vm1 = vmand %vm1868_vm11, %vm1873_vm12  ;;  %vm257_vm12 = vcmp.ge.s32.totalorder %v1541_v3, %v228_v48  ;;  %vm1937_vm0 = vcmp.ge.s32.totalorder %v1547_v5, %v229_v56 }
  0x79   : > { %vm349_vm4 = vmand %vm253_vm14, %vm317_vm15 }
  0x7a   : > { %vm1021_vm7 = vmpackc.low %vm349_vm4, %vm347_vm1  ;;  %vm1942_vm1 = vcmp.lt.s32.totalorder %v1547_v5, %v293_v57  ;;  %vm326_vm4 = vcmp.lt.s32.totalorder %v1547_v5, %v294_v61 }
  0x7b   : > { %1022 = vmatpush1.bf16.msk.msra.mxu0 %vm1021_vm7, %v1374_v33  ;;  %vm352_vm8 = vmand %vm1889_vm2, %vm1894_vm3  ;;  %vm262_vm3 = vcmp.ge.s32.totalorder %v1547_v5, %v230_v60  ;;  %vm259_vm7 = vcmp.ge.s32.totalorder %v1541_v3, %v229_v56  ;;  %v180_v5 = vld [vmem:[%s1531_s27] sm:$0xff] }
  0x7c   : > { %vm354_vm11 = vmand %vm1899_vm5, %vm1904_vm6 }
  0x7d   : > { %vm1023_vm14 = vmpackc.low %vm354_vm11, %vm352_vm8  ;;  %vm323_vm8 = vcmp.lt.s32.totalorder %v1541_v3, %v293_v57  ;;  %vm325_vm11 = vcmp.lt.s32.totalorder %v1541_v3, %v294_v61 }
  0x7e   : > { %1024 = vmatprep.subr.msk.bf16.mxu0 %vm1023_vm14, %v1374_v33  ;;  %vm351_vm15 = vmand %vm1914_vm9, %vm1919_vm10  ;;  %vm261_vm10 = vcmp.ge.s32.totalorder %v1541_v3, %v230_v60  ;;  %vm188_vm14 = vcmp.lt.s32.totalorder %v1539_v2, %v187_v0 }
  0x7f   : > { %vm353_vm2 = vmand %vm257_vm12, %vm321_vm13 }
  0x80   : > { %vm1025_vm5 = vmpackc.low %vm353_vm2, %vm351_vm15  ;;  %vm195_vm15 = vcmp.lt.s32.totalorder %v1541_v3, %v194_v6 }
  0x81   : > { %1026 = vmatpush1.bf16.msk.msra.mxu0 %vm1025_vm5, %v1374_v33  ;;  %vm356_vm6 = vmand %vm1937_vm0, %vm1942_vm1  ;;  %vm501_vm5 = vcmp.ge.s32.totalorder %v1539_v2, %v500_v11 }
  0x82   : > { %vm358_vm9 = vmand %vm262_vm3, %vm326_vm4  ;;  %vm189_vm3 = vcmp.lt.s32.totalorder %v1544_v4, %v187_v0 }
  0x83   : > { %vm1027_vm12 = vmpackc.low %vm358_vm9, %vm356_vm6  ;;  %vm509_vm6 = vcmp.lt.s32.totalorder %v1539_v2, %v508_v12  ;;  %vm510_vm9 = vcmp.lt.s32.totalorder %v1544_v4, %v508_v12 }
  0x84   : > { %1028 = vmatprep.subr.msk.bf16.mxu0 %vm1027_vm12, %v1374_v33  ;;  %vm355_vm13 = vmand %vm259_vm7, %vm323_vm8  ;;  %vm502_vm8 = vcmp.ge.s32.totalorder %v1544_v4, %v500_v11  ;;  %vm503_vm12 = vcmp.ge.s32.totalorder %v1552_v8, %v500_v11 }
  0x85   : > { %vm357_vm0 = vmand %vm261_vm10, %vm325_vm11  ;;  %vm533_vm10 = vcmask 130048  }
  0x86   : > { %vm1029_vm1 = vmpackc.low %vm357_vm0, %vm355_vm13  ;;  %vm511_vm13 = vcmp.lt.s32.totalorder %v1552_v8, %v508_v12  ;;  %vm512_vm0 = vcmp.lt.s32.totalorder %v1555_v9, %v508_v12 }
  0x87   : > { %1030 = vmatpush1.bf16.msk.msra.mxu0 %vm1029_vm1, %v1374_v33  ;;  %vm196_vm2 = vmand %vm188_vm14, %vm195_vm15 }
  0x88   : > { %vm197_vm4 = vmand %vm189_vm3, %vm195_vm15  ;;  %vm504_vm15 = vcmp.ge.s32.totalorder %v1555_v9, %v500_v11  ;;  %vm513_vm3 = vcmp.lt.s32.totalorder %v1571_v16, %v508_v12 }
  0x89   : > { %vm515_vm7 = vmand %vm501_vm5, %vm509_vm6  ;;  %vm506_vm5 = vcmp.ge.s32.totalorder %v1574_v17, %v500_v11  ;;  %vm514_vm6 = vcmp.lt.s32.totalorder %v1574_v17, %v508_v12 }
  0x8a   : > { %967 = vmatmul.mubr.msk.f32.vlgmr.msra.gmra.mrb[0].mxu0 %vm196_vm2, %v180_v5  ;;  %v969_v3 = vsel %vm515_vm7, 1.0, %v1373_v1  ;;  %vm516_vm11 = vmand %vm502_vm8, %vm510_vm9  ;;  %vm505_vm2 = vcmp.ge.s32.totalorder %v1571_v16, %v500_v11 }
  0x8b   : > { %493 = vmatprep.mubr.f32.mxu0 %v1373_v1  ;;  %v970_v2 = vsel %vm516_vm11, 1.0, %v1373_v1  ;;  %vm517_vm14 = vmand %vm503_vm12, %vm511_vm13 }
  0x8c   : > { %v971_v4 = vsel %vm517_vm14, 1.0, %v1373_v1  ;;  %vm518_vm1 = vmand %vm504_vm15, %vm512_vm0 }
  0x8d   : > { %v972_v8 = vsel %vm518_vm1, 1.0, %v1373_v1  ;;  %vm520_vm7 = vmand %vm506_vm5, %vm514_vm6 }
  0x8e   : > { %968 = vmatmul.mubr.msk.f32.gmra.mrb[2].mxu0 %vm197_vm4, %v181_v7  ;;  %vm519_vm4 = vmand %vm505_vm2, %vm513_vm3  ;;  %v974_v16 = vsel %vm520_vm7, 1.0, %v1373_v1 }
  0x8f   : > { %v973_v9 = vsel %vm519_vm4, 1.0, %v1373_v1 }
 0x15d   : > { %v489_v13 = vpop.f32.mrb[0].mxu0 }
 0x15e   : > { %v491_v14 = vpop.f32.mrb[1].mxu0 }
 0x161   : > { %v495_v33 = vpop.f32.mrb[2].mxu0 }
 0x162   : > { %v1033_v15 = vpack.c.bf16 %v495_v33, %v489_v13  ;;  %v497_v18 = vpop.f32.mrb[3].mxu0 }
 0x163   : > { %v1031_v19 = vpack.c.bf16 %v497_v18, %v491_v14 }
 0x165   : > { %1032 = vmatprep.subr.bf16.mxu1 %v1031_v19 }
 0x166   : > { %1034 = vmatpush1.bf16.msra.mxu1 %v1033_v15 }
 0x169   : > { %975 = vmatmul.mubr.msk.f32.vlgmr.msra.gmra.mrb[0].mxu1 %vm533_vm10, %v969_v3 }
 0x16a   : > { %622 = vmatprep.mubr.f32.mxu1 %v1373_v1 }
 0x16d   : > { %976 = vmatmul.mubr.msk.f32.gmra.mrb[2].mxu1 %vm533_vm10, %v970_v2 }
 0x16e   : > { %628 = vmatprep.mubr.f32.mxu1 %v1373_v1 }
 0x171   : > { %977 = vmatmul.mubr.msk.f32.gmra.mrb[4].mxu1 %vm533_vm10, %v971_v4 }
 0x172   : > { %634 = vmatprep.mubr.f32.mxu1 %v1373_v1 }
 0x175   : > { %978 = vmatmul.mubr.msk.f32.gmra.mrb[6].mxu1 %vm533_vm10, %v972_v8 }
 0x176   : > { %640 = vmatprep.mubr.f32.mxu1 %v1373_v1 }
 0x179   : > { %979 = vmatmul.mubr.msk.f32.gmra.mrb[8].mxu1 %vm533_vm10, %v973_v9 }
 0x17a   : > { %646 = vmatprep.mubr.f32.mxu1 %v1373_v1 }
 0x17d   : > { %980 = vmatmul.mubr.msk.f32.gmra.mrb[10].mxu1 %vm533_vm10, %v974_v16 }
 0x23c   : > { %v618_v20 = vpop.f32.mrb[0].mxu1 }
 0x23d   : > { %653 = vst [vmem:[%s1997_s28] sm:$0xff] %v618_v20  ;;  %v620_v17 = vpop.f32.mrb[1].mxu1 }
 0x23e   : > { %654 = vst [vmem:[%s1997_s28 + $0x8] sm:$0xff] %v620_v17 }
 0x240   : > { %v624_v1 = vpop.f32.mrb[2].mxu1 }
 0x241   : > { %655 = vst [vmem:[%s1997_s28 + $0x10] sm:$0xff] %v624_v1  ;;  %v626_v21 = vpop.f32.mrb[3].mxu1 }
 0x242   : > { %656 = vst [vmem:[%s1997_s28 + $0x18] sm:$0xff] %v626_v21 }
 0x244   : > { %v630_v22 = vpop.f32.mrb[4].mxu1 }
 0x245   : > { %657 = vst [vmem:[%s1997_s28 + $0x20] sm:$0xff] %v630_v22  ;;  %v632_v23 = vpop.f32.mrb[5].mxu1 }
 0x246   : > { %658 = vst [vmem:[%s1997_s28 + $0x28] sm:$0xff] %v632_v23 }
 0x248   : > { %v636_v24 = vpop.f32.mrb[6].mxu1 }
 0x249   : > { %659 = vst [vmem:[%s1997_s28 + $0x30] sm:$0xff] %v636_v24  ;;  %v638_v25 = vpop.f32.mrb[7].mxu1 }
 0x24a   : > { %660 = vst [vmem:[%s1997_s28 + $0x38] sm:$0xff] %v638_v25 }
 0x24c   : > { %v642_v26 = vpop.f32.mrb[8].mxu1  ;;  %671 = sbr.rel (!%p1467_p10) target bundleno = 656 (0x290), region = 32 }
 0x24d   : > { %661 = vst [vmem:[%s1997_s28 + $0x40] sm:$0xff] %v642_v26  ;;  %v644_v27 = vpop.f32.mrb[9].mxu1 }
 0x24e   : > { %662 = vst [vmem:[%s1997_s28 + $0x48] sm:$0xff] %v644_v27 }
 0x250   : > { %v648_v28 = vpop.f32.mrb[10].mxu1 }
 0x251   : > { %663 = vst [vmem:[%s1997_s28 + $0x50] sm:$0xff] %v648_v28  ;;  %v650_v29 = vpop.f32.mrb[11].mxu1 }
 0x252   : > { %664 = vst [vmem:[%s1997_s28 + $0x58] sm:$0xff] %v650_v29 }
 0x253   : > { %s2234_s6 = smov (!%p675_p8, %s674_s6), 6 }
 0x254   : > { %s997_s27 = sshll.u32 %s2234_s6, 8 }
 0x255   : > { %p987_p10 = scmp.eq.s32.totalorder %s997_s27, 0 }
 0x256   : > { %1189 = sdivrem.u32 (!%p987_p10), %s2234_s6, 6 }
 0x257   : > { %688 = sbr.rel (%p987_p10) target bundleno = 656 (0x290), region = 36 }
 0x25f   : > { %s2026_s9 = spop.drf %1189 }
 0x260   : > { %p988_p0 = scmp.le.s32.totalorder %s2026_s9, 0 }
 0x261   : > { %s2209_s10 = smov (!%p988_p0), %s2023_s5  ;;  %s2210_s11 = smov (!%p988_p0), %s1997_s28 }
 0x262   : > { %823 = sbr.rel (%p988_p0) target bundleno = 627 (0x273), region = 90  ;;  %s2035_s18 = smov (!%p988_p0), 0  }
 0x263   : > { %s2037_s26 = smov (!%p988_p0), 0  }
 0x269 LB: >> { %v702_v30 = vld [vmem:[%s1343_s11] sm:$0xff]  ;;  %v704_v31 = vld [vmem:[%s1343_s11 + $0x10] sm:$0xff]  ;;  %s726_s3 = sadd.s32 1, %s1347_s18  ;;  %v714_v37 = vld [vmem:[%s1343_s11 + $0x8] sm:$0xff]  ;;  %s696_s26 = sadd.s32 1, %s1351_s26   ;;  %s1351_s26 = sphi %s2037_s26, %s696_s26   ;;  %s1347_s18 = sphi %s2035_s18, %s2211_s18   ;;  %s1343_s11 = sphi %s2210_s11, %s731_s11   ;;  %s1339_s10 = sphi %s2209_s10, %s732_s10  }
 0x26a   : >> { %v706_v32 = vld [vmem:[%s1343_s11 + $0x20] sm:$0xff]  ;;  %703 = vst [vmem:[%s1339_s10] sm:$0xff] %v702_v30  ;;  %705 = vst [vmem:[%s1339_s10 + $0x20] sm:$0xff] %v704_v31  ;;  %v708_v34 = vld [vmem:[%s1343_s11 + $0x30] sm:$0xff]  ;;  %p727_p11 = scmp.ge.s32.totalorder %s726_s3, %s2026_s9  ;;  %p695_p12 = scmp.ge.s32.totalorder %s696_s26, %s2026_s9 }
 0x26b   : >> { %707 = vst [vmem:[%s1339_s10 + $0x40] sm:$0xff] %v706_v32  ;;  %v710_v35 = vld [vmem:[%s1343_s11 + $0x40] sm:$0xff]  ;;  %v712_v36 = vld [vmem:[%s1343_s11 + $0x50] sm:$0xff]  ;;  %709 = vst [vmem:[%s1339_s10 + $0x60] sm:$0xff] %v708_v34 }
 0x26c   : >> { %711 = vst [vmem:[%s1339_s10 + $0x80] sm:$0xff] %v710_v35  ;;  %713 = vst [vmem:[%s1339_s10 + $0xa0] sm:$0xff] %v712_v36  ;;  %v716_v38 = vld [vmem:[%s1343_s11 + $0x18] sm:$0xff]  ;;  %v718_v39 = vld [vmem:[%s1343_s11 + $0x28] sm:$0xff]  ;;  %s2236_s3 = smov (%p727_p11, %s726_s3), 0  ;;  %698 = sbr.rel (!%p695_p12) target bundleno = 617 (0x269), region = 96 }
 0x26d   : >> { %715 = vst [vmem:[%s1339_s10 + $0x8] sm:$0xff] %v714_v37  ;;  %717 = vst [vmem:[%s1339_s10 + $0x28] sm:$0xff] %v716_v38  ;;  %v720_v40 = vld [vmem:[%s1343_s11 + $0x38] sm:$0xff]  ;;  %v722_v41 = vld [vmem:[%s1343_s11 + $0x48] sm:$0xff]  ;;  %s729_s30 = smul.u32 96, %s2236_s3  ;;  %s2211_s18 = smov %s2236_s3 }
 0x26e   : >> { %719 = vst [vmem:[%s1339_s10 + $0x48] sm:$0xff] %v718_v39  ;;  %v724_v42 = vld [vmem:[%s1343_s11 + $0x58] sm:$0xff]  ;;  %721 = vst [vmem:[%s1339_s10 + $0x68] sm:$0xff] %v720_v40  ;;  %s730_s2 = smul.u32 192, %s2236_s3 }
 0x26f   : >> { %723 = vst [vmem:[%s1339_s10 + $0x88] sm:$0xff] %v722_v41  ;;  %725 = vst [vmem:[%s1339_s10 + $0xa8] sm:$0xff] %v724_v42  ;;  %s731_s11 = scalar_lea.vmem %s1997_s28, %s729_s30 [#allocation4]  }
 0x270   : >> { %s732_s10 = scalar_lea.vmem %s2023_s5, %s730_s2  }
 0x273 PF: > { %1191 = sdivrem.u32 %s2234_s6, 6 }
 0x274   : > { %s989_s4 = smul.u32 96, %s2026_s9 }
 0x275   : > { %s990_s22 = smul.u32 192, %s2026_s9 }
 0x276   : > { %s2062_s20 = scalar_lea.vmem %s1997_s28, %s989_s4 [#allocation4]  }
 0x277   : > { %s2065_s23 = scalar_lea.vmem %s2023_s5, %s990_s22  }
 0x27c   : > { %s2067_s25 = spop.drf %1191 }
 0x27d   : > { %p991_p13 = scmp.le.s32.totalorder %s2067_s25, 0 }
 0x27e   : > { %s1353_s27 = smov (!%p991_p13), %s2065_s23   ;;  %s1357_s21 = smov (!%p991_p13), %s2062_s20  }
 0x27f   : > { %837 = sbr.rel (%p991_p13) target bundleno = 656 (0x290), region = 101  ;;  %s1361_s24 = smov (!%p991_p13), 0  }
 0x280   : > { %s1365_s10 = smov (!%p991_p13), 0  }
 0x286 LB: >> { %v749_v43 = vld [vmem:[%s1359_s21] sm:$0xff]  ;;  %v751_v44 = vld [vmem:[%s1359_s21 + $0x8] sm:$0xff]  ;;  %s753_s28 = sadd.s32 1, %s1363_s24  ;;  %s743_s10 = sadd.s32 1, %s1367_s10   ;;  %s1367_s10 = sphi %s1365_s10, %s743_s10   ;;  %s1363_s24 = sphi %s1361_s24, %s1362_s24   ;;  %s1359_s21 = sphi %s1357_s21, %s758_s21   ;;  %s1355_s27 = sphi %s1353_s27, %s759_s27  }
 0x287   : >> { %750 = vst [vmem:[%s1355_s27] sm:$0xff] %v749_v43  ;;  %752 = vst [vmem:[%s1355_s27 + $0x8] sm:$0xff] %v751_v44  ;;  %p754_p1 = scmp.ge.s32.totalorder %s753_s28, %s2067_s25  ;;  %p742_p2 = scmp.ge.s32.totalorder %s743_s10, %s2067_s25 }
 0x289   : >> { %s2238_s28 = smov (%p754_p1, %s753_s28), 0  ;;  %745 = sbr.rel (!%p742_p2) target bundleno = 646 (0x286), region = 107 }
 0x28a   : >> { %s992_s6 = sshll.u32 %s2238_s28, 4  ;;  %s993_s5 = sshll.u32 %s2238_s28, 5 }
 0x28b   : >> { %s758_s21 = scalar_lea.vmem %s2062_s20, %s992_s6 [#allocation4]   ;;  %s759_s27 = scalar_lea.vmem %s2065_s23, %s993_s5  }
 0x28c   : >> { %s1362_s24 = smov %s2238_s28  }
 0x290 PF: > { %s14_s15 = sadd.s32 1, %s1335_s15   ;;  %s2212_s6 = smov %s1303_s7 }
 0x291   : > { %p11_p4 = scmp.ge.s32.totalorder %s14_s15, 38   ;;  %s2213_s7 = smov %s1307_s8 }
 0x292   : > { %s2214_s8 = smov %s1475_s29  ;;  %s2215_s9 = smov %s1323_s12 }
 0x293   : > { %s2216_s10 = smov %s1327_s13  ;;  %s2217_s11 = smov %s1331_s14 }
 0x294   : > { %s2218_s12 = smov %s2222_s16  ;;  %s2219_s13 = smov %s2226_s17 }
 0x295   : > { %s2220_s14 = smov %s2230_s19  ;;  %13 = sbr.rel (!%p11_p4) target bundleno = 6 (0x6), region = 118 }
 0x29c   :  { %775 = vsyncpa [#allocation3], 1 }
 0x29d   :  { %777 = vsyncpa [#allocation3 + $0x1], 1 }

</bundles_post_ra>
